<compile_context>
chip_gen: v5e
topology: v5e:2x2
jax: 0.10.0
libtpu: 0.0.40
codegen_flags: <defaults>
</compile_context>

<pallas_src>
import functools

import jax
import jax.numpy as jnp
from jax.experimental import pallas as pl
from jax.experimental.pallas import tpu as pltpu


def _round_up(v, m):
    return (v + m - 1) // m * m


def _corn_kernel(x_ref, t_ref, sel_ref, task_ref, num_ref, *, CK, CK_pad):
    """One batch tile: emit per-column partial numerator sums (1, CK_pad)."""
    # Native-dtype load; bf16 -> f32 cast is a cheap VPU op.
    x = x_ref[...].astype(jnp.float32)                      # (TB, CK)

    # Broadcast each chunk's target across its Km1 task columns with a tiny
    # single-pass bf16 MXU matmul (exact: one nonzero per output column,
    # small integer values). sel/task are constant, VMEM-resident inputs.
    t_full = jnp.dot(t_ref[...], sel_ref[...],
                     preferred_element_type=jnp.float32)    # (TB, CK)
    s = t_full - task_ref[...]                              # exact small ints

    # Numerically stable log-sigmoid (exp/log1p run on the EUP slot).
    ls = jnp.minimum(x, 0.0) - jnp.log1p(jnp.exp(-jnp.abs(x)))

    # masked per-element CORN loss:
    #   per*mask = x*(target==i) - (target>=i)*logsigmoid(x)
    # Padded/OOB rows carry target == -1  ->  s < 0 everywhere  ->  contrib 0
    # (garbage x in unselected lanes is discarded by the selects).
    contrib = jnp.where(s == 0.0, x, 0.0) - jnp.where(s >= 0.0, ls, 0.0)

    row = jnp.sum(contrib, axis=0, keepdims=True)           # (1, CK)
    if CK_pad != CK:
        row = jnp.concatenate(
            [row, jnp.zeros((1, CK_pad - CK), jnp.float32)], axis=1)
    num_ref[0] = row                                         # (1, CK_pad)


def corn_loss_multi_pallas(logits, targets, class_labels_num,
                           *, max_block_bytes=4 * 1024 * 1024):
    """logits: [B, C*(K-1)] (f32 or bf16), targets: [B, C] int. Scalar loss."""
    B, CK = logits.shape
    Km1 = class_labels_num
    C = CK // Km1
    assert C * Km1 == CK, "logits last dim must be a multiple of class_labels_num"
    # bf16 targets / selector are exact only for small integer values.
    assert class_labels_num <= 255, "class_labels_num must be <= 255"

    x = logits                                 # native dtype: no wrapper upcast
    t = targets.astype(jnp.bfloat16)           # tiny exact ints, feeds MXU directly

    lane_x = _round_up(CK, 128)
    lane_t = _round_up(C, 128)
    CK_pad = lane_x

    # Batch tile sized on the padded f32 working width of one row; keeps the
    # in-kernel f32 intermediates plus double-buffered inputs well inside the
    # scoped-VMEM budget on every generation (v5e 16 MiB default, v7x 64 MiB
    # physical per TC).
    row_f32 = lane_x * 4
    TB_cap = max(8, (max_block_bytes // row_f32) // 8 * 8)
    TB = min(_round_up(B, 8), TB_cap)
    G = pl.cdiv(B, TB)
    B_pad = G * TB

    if B_pad != B:
        # Pad only the tiny targets array with -1 (fully masks the garbage
        # OOB logits rows of the last tile inside the kernel). Logits are NOT
        # copied/padded.
        t = jnp.pad(t, ((0, B_pad - B), (0, 0)), constant_values=-1.0)

    # Constant selector / task-index tensors, hoisted out of the kernel.
    col = jnp.arange(CK)
    sel = (col[None, :] // Km1 == jnp.arange(C)[:, None]).astype(jnp.bfloat16)  # (C, CK)
    task = (col % Km1).astype(jnp.float32)[None, :]                             # (1, CK)

    kernel = functools.partial(_corn_kernel, CK=CK, CK_pad=CK_pad)

    # Explicit VMEM budget: double-buffered inputs + generous headroom for the
    # kernel's f32 intermediates + resident constants + outputs.
    in_bytes = 2 * TB * (lane_x * x.dtype.itemsize + lane_t * 2)
    tmp_bytes = 6 * TB * row_f32
    const_bytes = _round_up(C, 16) * lane_x * 2 + 8 * lane_x * 4
    vmem_limit = int(min(48 * 2**20,
                         max(in_bytes + tmp_bytes + const_bytes + (2 << 20),
                             24 * 2**20)))

    num_part = pl.pallas_call(
        kernel,
        out_shape=jax.ShapeDtypeStruct((G, 1, CK_pad), jnp.float32),
        grid_spec=pltpu.PrefetchScalarGridSpec(
            num_scalar_prefetch=0,
            grid=(G,),
            in_specs=[
                pl.BlockSpec((TB, CK), lambda i: (i, 0)),   # logits batch tile
                pl.BlockSpec((TB, C), lambda i: (i, 0)),    # bf16 targets tile
                pl.BlockSpec((C, CK), lambda i: (0, 0)),    # resident selector
                pl.BlockSpec((1, CK), lambda i: (0, 0)),    # resident task idx
            ],
            out_specs=pl.BlockSpec((1, 1, CK_pad), lambda i: (i, 0, 0)),
        ),
        compiler_params=pltpu.CompilerParams(
            dimension_semantics=("parallel",),   # per-tile partials; v7x dual-TC
            vmem_limit_bytes=vmem_limit,
        ),
    )(x, t, sel, task)

    # Tiny final reductions in plain JAX.
    num = num_part[:, 0, :CK].sum(axis=0).reshape(C, Km1).sum(axis=1)      # (C,)
    # den_c = sum_b #(tasks with target >= i) = sum_b min(target+1, Km1) >= B > 0
    den = jnp.sum(jnp.minimum(targets.astype(jnp.int32) + 1, Km1),
                  axis=0).astype(jnp.float32)                              # (C,)
    return jnp.mean(num / den)


# TODO(synk): logits2labels (inference-time ordinal decoding) not implemented; forward loss only.


# --- pure-JAX reference (mirrors coral_pytorch corn_loss exactly) ------------
def _corn_loss_ref(chunk, targets, num_classes):
    Km1 = num_classes - 1
    i = jnp.arange(Km1)
    mask = (targets[:, None] >= i).astype(jnp.float32)
    label = (targets[:, None] > i).astype(jnp.float32)
    ls = jax.nn.log_sigmoid(chunk)
    per = -(ls * label + (ls - chunk) * (1.0 - label))
    return jnp.sum(per * mask) / jnp.sum(mask)


def corn_loss_multi_ref(logits, targets, class_labels_num):
    logits = logits.astype(jnp.float32)
    C = logits.shape[1] // class_labels_num
    total = 0.0
    for c in range(C):
        chunk = logits[:, c * class_labels_num:(c + 1) * class_labels_num]
        total = total + _corn_loss_ref(chunk, targets[:, c], class_labels_num + 1)
    return total / C


if __name__ == "__main__":
    class_labels_num = 4      # K-1 binary tasks per chunk -> 5 ordinal classes
    num_chunks = 3            # number of label groups
    batch = 32

    key = jax.random.PRNGKey(0)
    k1, k2 = jax.random.split(key)
    logits = jax.random.normal(
        k1, (batch, num_chunks * class_labels_num), dtype=jnp.float32)
    targets = jax.random.randint(
        k2, (batch, num_chunks), 0, class_labels_num + 1, dtype=jnp.int32)

    fn = jax.jit(lambda lg, tg: corn_loss_multi_pallas(lg, tg, class_labels_num))

    # f32 logits path
    loss = jax.block_until_ready(fn(logits, targets))
    ref = corn_loss_multi_ref(logits, targets, class_labels_num)
    assert jnp.allclose(loss, ref, atol=1e-5, rtol=1e-5), (loss, ref)

    # bf16 logits path (native-dtype read, f32 math inside the kernel)
    logits_bf = logits.astype(jnp.bfloat16)
    loss_bf = jax.block_until_ready(fn(logits_bf, targets))
    ref_bf = corn_loss_multi_ref(logits_bf, targets, class_labels_num)
    assert jnp.allclose(loss_bf, ref_bf, atol=1e-4, rtol=1e-4), (loss_bf, ref_bf)

    # ragged batch (B not a multiple of 8): exercises the masked edge tile
    loss_r = jax.block_until_ready(fn(logits[:27], targets[:27]))
    ref_r = corn_loss_multi_ref(logits[:27], targets[:27], class_labels_num)
    assert jnp.allclose(loss_r, ref_r, atol=1e-5, rtol=1e-5), (loss_r, ref_r)

    print("KERNEL_OK")
</pallas_src>

<mosaic_0001>
module attributes {stable_mosaic.version = 11 : i64} {
  func.func @_corn_kernel(%arg0: i32, %arg1: memref<32x12xf32, #tpu.memory_space<vmem>>, %arg2: memref<32x3xbf16, #tpu.memory_space<vmem>>, %arg3: memref<3x12xbf16, #tpu.memory_space<vmem>>, %arg4: memref<1x12xf32, #tpu.memory_space<vmem>>, %arg5: memref<1x1x128xf32, #tpu.memory_space<vmem>>) attributes {dimension_semantics = [#tpu.dimension_semantics<parallel>], iteration_bounds = array<i64: 1>, scalar_prefetch = 0 : i64, scratch_operands = 0 : i64, tpu.core_type = #tpu.core_type<tc>, window_params = [{transform_indices = @transform_0, window_bounds = array<i64: 32, 12>}, {transform_indices = @transform_1, window_bounds = array<i64: 32, 3>}, {pipeline_mode = #tpu.pipeline_mode<synchronous>, transform_indices = @transform_2, window_bounds = array<i64: 3, 12>}, {pipeline_mode = #tpu.pipeline_mode<synchronous>, transform_indices = @transform_3, window_bounds = array<i64: 1, 12>}, {transform_indices = @transform_4, window_bounds = array<i64: 1, 1, 128>}]} {
    %c0 = arith.constant 0 : index
    %c0_0 = arith.constant 0 : index
    %0 = vector.load %arg1[%c0, %c0_0] : memref<32x12xf32, #tpu.memory_space<vmem>>, vector<32x12xf32>
    %c0_1 = arith.constant 0 : index
    %c0_2 = arith.constant 0 : index
    %1 = vector.load %arg2[%c0_1, %c0_2] : memref<32x3xbf16, #tpu.memory_space<vmem>>, vector<32x3xbf16>
    %c0_3 = arith.constant 0 : index
    %c0_4 = arith.constant 0 : index
    %2 = vector.load %arg3[%c0_3, %c0_4] : memref<3x12xbf16, #tpu.memory_space<vmem>>, vector<3x12xbf16>
    %cst = arith.constant dense<0.000000e+00> : vector<32x12xf32>
    %3 = tpu.matmul %1, %2, %cst {dimension_numbers = #tpu.dot_dimension_numbers<[1], [0], [0], [1], [0, 0, 1, 1], [], []>} : vector<32x3xbf16>, vector<3x12xbf16>, vector<32x12xf32> -> vector<32x12xf32>
    %c0_5 = arith.constant 0 : index
    %c0_6 = arith.constant 0 : index
    %4 = vector.load %arg4[%c0_5, %c0_6] : memref<1x12xf32, #tpu.memory_space<vmem>>, vector<1x12xf32>
    %5 = vector.broadcast %4 : vector<1x12xf32> to vector<32x12xf32>
    %6 = arith.subf %3, %5 : vector<32x12xf32>
    %cst_7 = arith.constant 0.000000e+00 : f32
    %7 = vector.broadcast %cst_7 : f32 to vector<32x12xf32>
    %8 = arith.minimumf %0, %7 : vector<32x12xf32>
    %9 = math.absf %0 : vector<32x12xf32>
    %cst_8 = arith.constant 0.000000e+00 : f32
    %10 = vector.broadcast %cst_8 : f32 to vector<32x12xf32>
    %11 = arith.subf %10, %9 : vector<32x12xf32>
    %12 = math.exp %11 : vector<32x12xf32>
    %13 = math.log1p %12 : vector<32x12xf32>
    %14 = arith.subf %8, %13 : vector<32x12xf32>
    %cst_9 = arith.constant 0.000000e+00 : f32
    %15 = vector.broadcast %cst_9 : f32 to vector<32x12xf32>
    %16 = arith.cmpf oeq, %6, %15 : vector<32x12xf32>
    %cst_10 = arith.constant 0.000000e+00 : f32
    %17 = vector.broadcast %cst_10 : f32 to vector<32x12xf32>
    %18 = arith.select %16, %0, %17 : vector<32x12xi1>, vector<32x12xf32>
    %cst_11 = arith.constant 0.000000e+00 : f32
    %19 = vector.broadcast %cst_11 : f32 to vector<32x12xf32>
    %20 = arith.cmpf oge, %6, %19 : vector<32x12xf32>
    %cst_12 = arith.constant 0.000000e+00 : f32
    %21 = vector.broadcast %cst_12 : f32 to vector<32x12xf32>
    %22 = arith.select %20, %14, %21 : vector<32x12xi1>, vector<32x12xf32>
    %23 = arith.subf %18, %22 : vector<32x12xf32>
    %cst_13 = arith.constant dense<0.000000e+00> : vector<12xf32>
    %24 = vector.multi_reduction <add>, %23, %cst_13 [0] : vector<32x12xf32> to vector<12xf32>
    %25 = vector.shape_cast %24 : vector<12xf32> to vector<1x12xf32>
    %cst_14 = arith.constant 0.000000e+00 : f32
    %26 = vector.broadcast %cst_14 : f32 to vector<1x116xf32>
    %27 = tpu.concatenate %25, %26 in 1 : vector<1x12xf32>, vector<1x116xf32> -> vector<1x128xf32>
    %c0_15 = arith.constant 0 : index
    %c0_16 = arith.constant 0 : index
    %c0_17 = arith.constant 0 : index
    %28 = vector.load %arg5[%c0_15, %c0_16, %c0_17] : memref<1x1x128xf32, #tpu.memory_space<vmem>>, vector<1x1x128xf32>
    %29 = vector.shape_cast %28 : vector<1x1x128xf32> to vector<1x128xf32>
    %30 = vector.shape_cast %27 : vector<1x128xf32> to vector<1x1x128xf32>
    tpu.vector_store %arg5[%c0_15, %c0_16, %c0_17], %30 {strides = array<i32>} : memref<1x1x128xf32, #tpu.memory_space<vmem>>, vector<1x1x128xf32>,
    return
  }
  func.func @transform_0(%arg0: i32) -> (i32, i32) {
    %c0_i32 = arith.constant 0 : i32
    %c0_i32_0 = arith.constant 0 : i32
    return %arg0, %c0_i32 : i32, i32
  }
  func.func @transform_1(%arg0: i32) -> (i32, i32) {
    %c0_i32 = arith.constant 0 : i32
    %c0_i32_0 = arith.constant 0 : i32
    return %arg0, %c0_i32 : i32, i32
  }
  func.func @transform_2(%arg0: i32) -> (i32, i32) {
    %c0_i32 = arith.constant 0 : i32
    %c0_i32_0 = arith.constant 0 : i32
    %c0_i32_1 = arith.constant 0 : i32
    return %c0_i32, %c0_i32_0 : i32, i32
  }
  func.func @transform_3(%arg0: i32) -> (i32, i32) {
    %c0_i32 = arith.constant 0 : i32
    %c0_i32_0 = arith.constant 0 : i32
    %c0_i32_1 = arith.constant 0 : i32
    return %c0_i32, %c0_i32_0 : i32, i32
  }
  func.func @transform_4(%arg0: i32) -> (i32, i32, i32) {
    %c0_i32 = arith.constant 0 : i32
    %c0_i32_0 = arith.constant 0 : i32
    %c0_i32_1 = arith.constant 0 : i32
    return %arg0, %c0_i32, %c0_i32_0 : i32, i32, i32
  }
}

</mosaic_0001>

<bundles_post_ra>
// kernel: _lambda_.1
= control target key start
LH: loop header
LB: loop body
LE: loop exit
PB: predicated region body
PF: predicated region fallthrough
CT: control target
= control target key end

     0   :  { %vm44_vm0 = vcmask 1040384   ;;  %vm45_vm1 = vcmask 1041408   ;;  %v209_v1 = vmov 65535   ;;  %vm37_vm2 = vcmask 23552   ;;  %s311_s2 = inlined_call_operand.vmem [shape: bf16[3,12], index: 2, kind: input, shape index: {}]   ;;  %s312_s1 = inlined_call_operand.vmem [shape: bf16[32,3], index: 1, kind: input, shape index: {}]   ;;  %s313_s3 = inlined_call_operand.vmem [shape: f32[1,12], index: 3, kind: input, shape index: {}]   ;;  %s314_s0 = inlined_call_operand.vmem [shape: f32[32,12], index: 0, kind: input, shape index: {}]   ;;  %s315_s4 = inlined_call_operand.vmem [shape: f32[1,1,128], index: 4, kind: output, shape index: {}]  }
   0x1   :  { %v26_v0 = vld [vmem:[%s311_s2] sm:$0x3]  ;;  %v46_v2 = vsel %vm44_vm0, 4294967295, %v209_v1  ;;  %v189_v6 = vld [vmem:[%s312_s1 + $0x8] sm:$0xff]  ;;  %v253_v9 = vld [vmem:[%s314_s0 + $0x10] sm:$0xff]  ;;  %vm158_vm11 = vcmask 97280  }
   0x2   :  { %v47_v3 = vsel %vm45_vm1, %v46_v2, 0  ;;  %v188_v5 = vld [vmem:[%s312_s1] sm:$0xff]  ;;  %v258_v10 = vld [vmem:[%s314_s0 + $0x8] sm:$0xff]  ;;  %v263_v11 = vld [vmem:[%s314_s0 + $0x18] sm:$0xff]  ;;  %v84_v12 = vand.u32 2147483647, %v253_v9 }
   0x3   :  { %v49_v4 = vand.u32 %v47_v3, %v26_v0  ;;  %v247_v7 = vld [vmem:[%s314_s0] sm:$0xff]  ;;  %v83_v14 = vand.u32 2147483647, %v258_v10  ;;  %v85_v15 = vand.u32 2147483647, %v263_v11  ;;  %v80_v63 = vmin.f32 %v253_v9, 0.0 }
   0x4   :  { %v82_v8 = vand.u32 2147483647, %v247_v7  ;;  %v88_v16 = vsub.f32 0.0, %v84_v12  ;;  %v192_v44 = vld [vmem:[%s313_s3] ss:$0 sm:$0xff]  ;;  %v78_v51 = vmin.f32 %v247_v7, 0.0 }
   0x5   :  { %58 = vmatpush.bf16.msra.mxu0 %v49_v4  ;;  %190 = vmatpush.bf16.msra.mxu1 %v49_v4  ;;  %v87_v18 = vsub.f32 0.0, %v83_v14  ;;  %v89_v19 = vsub.f32 0.0, %v85_v15 }
   0x6   :  { %v86_v13 = vsub.f32 0.0, %v82_v8  ;;  %v94_v20 = vmul.f32 1.442695, %v88_v16 }
   0x7   :  { %v92_v21 = vmul.f32 1.442695, %v87_v18  ;;  %v96_v22 = vmul.f32 1.442695, %v89_v19 }
   0x8   :  { %186 = vmatmul.msk.bf16.vlgmr.msra.gmra.mxu0 %vm37_vm2, %v188_v5  ;;  %187 = vmatmul.msk.bf16.vlgmr.msra.gmra.mxu1 %vm37_vm2, %v189_v6  ;;  %v90_v17 = vmul.f32 1.442695, %v86_v13  ;;  %v79_v5 = vmin.f32 %v258_v10, 0.0  ;;  %v81_v6 = vmin.f32 %v263_v11, 0.0 }
   0xa   :  { %193 = vpow2.f32 %v90_v17 }
   0xb   :  { %195 = vpow2.f32 %v94_v20 }
   0xc   :  { %197 = vpow2.f32 %v92_v21 }
   0xd   :  { %199 = vpow2.f32 %v96_v22 }
  0x10   :  { %v194_v23 = vpop.eup %193 }
  0x11   :  { %v196_v24 = vpop.eup %195  ;;  %v98_v25 = vadd.f32 1.0, %v194_v23  ;;  %v101_v30 = vmul.f32 -0.5, %v194_v23  ;;  %v104_v35 = vand.u32 2147483647, %v194_v23 }
  0x12   :  { %v198_v26 = vpop.eup %197  ;;  %v116_v28 = vadd.f32 1.0, %v196_v24  ;;  %v119_v32 = vmul.f32 -0.5, %v196_v24  ;;  %v122_v42 = vand.u32 2147483647, %v196_v24 }
  0x13   :  { %v200_v27 = vpop.eup %199  ;;  %201 = vlog2.f32 %v98_v25  ;;  %v107_v29 = vadd.f32 1.0, %v198_v26  ;;  %v102_v33 = vadd.f32 1.0, %v101_v30  ;;  %v110_v36 = vmul.f32 -0.5, %v198_v26 }
  0x14   :  { %v125_v31 = vadd.f32 1.0, %v200_v27  ;;  %203 = vlog2.f32 %v116_v28  ;;  %v128_v37 = vmul.f32 -0.5, %v200_v27  ;;  %v120_v38 = vadd.f32 1.0, %v119_v32 }
  0x15   :  { %205 = vlog2.f32 %v107_v29  ;;  %v103_v41 = vmul.f32 %v194_v23, %v102_v33  ;;  %vm271_vm3 = vcmp.lt.f32.partialorder %v104_v35, 0.0004427343  ;;  %v111_v46 = vadd.f32 1.0, %v110_v36 }
  0x16   :  { %207 = vlog2.f32 %v125_v31  ;;  %v129_v47 = vadd.f32 1.0, %v128_v37  ;;  %v113_v49 = vand.u32 2147483647, %v198_v26  ;;  %v131_v50 = vand.u32 2147483647, %v200_v27 }
  0x17   :  { %v121_v53 = vmul.f32 %v196_v24, %v120_v38  ;;  %vm278_vm4 = vcmp.lt.f32.partialorder %v122_v42, 0.0004427343  ;;  %v112_v60 = vmul.f32 %v198_v26, %v111_v46 }
  0x18   :  { %v130_v62 = vmul.f32 %v200_v27, %v129_v47  ;;  %vm283_vm5 = vcmp.lt.f32.partialorder %v113_v49, 0.0004427343  ;;  %vm287_vm6 = vcmp.lt.f32.partialorder %v131_v50, 0.0004427343 }
  0x19   :  { %v202_v34 = vpop.eup %201 }
  0x1a   :  { %v204_v39 = vpop.eup %203  ;;  %v100_v40 = vmul.f32 0.6931472, %v202_v34 }
  0x1b   :  { %v206_v43 = vpop.eup %205  ;;  %v118_v52 = vmul.f32 0.6931472, %v204_v39 }
  0x1c   :  { %v208_v48 = vpop.eup %207  ;;  %v106_v55 = vsel %vm271_vm3, %v103_v41, %v100_v40  ;;  %v109_v58 = vmul.f32 0.6931472, %v206_v43 }
  0x1d   :  { %v127_v61 = vmul.f32 0.6931472, %v208_v48  ;;  %v134_v2 = vsub.f32 %v78_v51, %v106_v55  ;;  %v124_v4 = vsel %vm278_vm4, %v121_v53, %v118_v52 }
  0x1e   :  { %v115_v8 = vsel %vm283_vm5, %v112_v60, %v109_v58  ;;  %v136_v13 = vsub.f32 %v80_v63, %v124_v4 }
  0x1f   :  { %v133_v12 = vsel %vm287_vm6, %v130_v62, %v127_v61  ;;  %v135_v17 = vsub.f32 %v79_v5, %v115_v8 }
  0x20   :  { %v137_v19 = vsub.f32 %v81_v6, %v133_v12 }
  0x85   :  { %v60_v54 = vpop.f32.mrf.mxu0  ;;  %v65_v56 = vpop.f32.mrf.mxu1 }
  0x86   :  { %v74_v59 = vsub.f32 %v60_v54, %v192_v44  ;;  %v76_v3 = vsub.f32 %v65_v56, %v192_v44 }
  0x88   :  { %vm138_vm7 = vcmp.eq.f32.partialorder %v74_v59, 0.0  ;;  %vm146_vm8 = vcmp.ge.f32.partialorder %v74_v59, 0.0  ;;  %vm140_vm9 = vcmp.eq.f32.partialorder %v76_v3, 0.0  ;;  %vm148_vm10 = vcmp.ge.f32.partialorder %v76_v3, 0.0 }
  0x89   :  { %v142_v14 = vsel %vm138_vm7, %v247_v7, 0.0  ;;  %v150_v15 = vsel %vm146_vm8, %v134_v2, 0.0  ;;  %v144_v23 = vsel %vm140_vm9, %v253_v9, 0.0  ;;  %v152_v24 = vsel %vm148_vm10, %v136_v13, 0.0 }
  0x8a   :  { %v154_v22 = vsub.f32 %v142_v14, %v150_v15  ;;  %v156_v28 = vsub.f32 %v144_v23, %v152_v24 }
  0x8c   :  { %v159_v30 = vsel %vm158_vm11, %v154_v22, 0.0  ;;  %v162_v9 = vsel %vm158_vm11, %v156_v28, 0.0 }
  0x8d   :  { %v62_v16 = vpop.f32.mrf.mxu0  ;;  %v67_v18 = vpop.f32.mrf.mxu1 }
  0x8e   :  { %v75_v20 = vsub.f32 %v62_v16, %v192_v44  ;;  %v77_v21 = vsub.f32 %v67_v18, %v192_v44 }
  0x90   :  { %vm139_vm12 = vcmp.eq.f32.partialorder %v75_v20, 0.0  ;;  %vm147_vm13 = vcmp.ge.f32.partialorder %v75_v20, 0.0  ;;  %vm141_vm14 = vcmp.eq.f32.partialorder %v77_v21, 0.0  ;;  %vm149_vm15 = vcmp.ge.f32.partialorder %v77_v21, 0.0 }
  0x91   :  { %v143_v7 = vsel %vm139_vm12, %v258_v10, 0.0  ;;  %v151_v25 = vsel %vm147_vm13, %v135_v17, 0.0  ;;  %v145_v26 = vsel %vm141_vm14, %v263_v11, 0.0  ;;  %v153_v27 = vsel %vm149_vm15, %v137_v19, 0.0 }
  0x92   :  { %v155_v29 = vsub.f32 %v143_v7, %v151_v25  ;;  %v157_v32 = vsub.f32 %v145_v26, %v153_v27 }
  0x94   :  { %v160_v31 = vsel %vm158_vm11, %v155_v29, 0.0  ;;  %v164_v35 = vsel %vm158_vm11, %v157_v32, 0.0 }
  0x95   :  { %v161_v33 = vadd.f32 %v160_v31, %v159_v30 }
  0x97   :  { %v163_v34 = vadd.f32 %v162_v9, %v161_v33 }
  0x99   :  { %v165_v36 = vadd.f32 %v164_v35, %v163_v34 }
  0x9b   :  { %v166_v37 = vrot.slane %v165_v36, 4 }
  0x9d   :  { %v167_v10 = vadd.f32 %v166_v37, %v165_v36 }
  0x9f   :  { %v168_v38 = vrot.slane %v167_v10, 2 }
  0xa1   :  { %v169_v39 = vadd.f32 %v168_v38, %v167_v10 }
  0xa3   :  { %v170_v11 = vrot.slane %v169_v39, 1 }
  0xa5   :  { %v171_v40 = vadd.f32 %v170_v11, %v169_v39 }
  0xa7   :  { %v172_v41 = vsel %vm158_vm11, %v171_v40, 0.0 }
  0xa8   :  { %173 = vst [vmem:[%s315_s4] sm:$0x1] %v172_v41 }

</bundles_post_ra>
